<compile_context>
chip_gen: v6e
topology: v6e:2x2x1
jax: 0.10.0
libtpu: 0.0.40
codegen_flags: <defaults>
</compile_context>

<pallas_src>
import re

import jax
import jax.numpy as jnp
from jax.experimental import pallas as pl
from jax.experimental.pallas import tpu as pltpu

LANES = 1024  # lane-dense last dim (multiple of 128)


def _htanh_kernel(x_ref, o_ref):
    x = x_ref[...].astype(jnp.float32)
    # relu6(x)/3 - 1 ; constant multiply instead of divide (single VALU op).
    y = jnp.minimum(jnp.maximum(x, 0.0), 6.0) * (1.0 / 3.0) - 1.0
    o_ref[...] = y.astype(o_ref.dtype)


def htanh_ref(x):
    return jnp.clip(x, 0.0, 6.0) * (1.0 / 3.0) - 1.0


def _tpu_generation():
    try:
        kind = jax.devices()[0].device_kind  # e.g. "TPU v5 lite", "TPU v6e"
        m = re.search(r"v(\d+)", kind)
        return int(m.group(1)) if m else 0
    except Exception:
        return 0


def htanh(x):
    """Elementwise relu6(x)/3 - 1, matching the PyTorch HTanh.forward."""
    orig_shape = x.shape
    dtype = x.dtype
    size = x.size
    if size == 0:
        return x

    flat = x.reshape(-1)
    aligned = (size // LANES) * LANES
    tail = size - aligned

    # Whole tensor smaller than one lane-dense row: plain jnp is optimal.
    if aligned == 0:
        return htanh_ref(x).astype(dtype)

    rows = aligned // LANES
    itemsize = jnp.dtype(dtype).itemsize
    sub = max(8, 32 // itemsize)  # sublane packing: f32->8, bf16->16, i8->32

    # Per-step byte budget: 2 MiB (safe under v5e's 16 MiB scoped VMEM with
    # in+out double buffering), bumped to 4 MiB on v6e/v7x.
    gen = _tpu_generation()
    if gen >= 6:
        tile_bytes = 4 << 20
        vmem_limit = 48 << 20
    else:
        tile_bytes = 2 << 20
        vmem_limit = None

    tile_rows = max(sub, (tile_bytes // (LANES * itemsize)) // sub * sub)

    if rows <= tile_rows:
        # Fits in one tile: split into two blocks when possible so a v7x
        # megacore can stream from both TensorCores.  Harmless elsewhere.
        half = ((rows + 1) // 2 + sub - 1) // sub * sub
        tile_rows = half if 0 < half < rows else rows

    grid = (pl.cdiv(rows, tile_rows),)

    head = flat[:aligned].reshape(rows, LANES) if tail else flat.reshape(rows, LANES)

    cp_kwargs = dict(dimension_semantics=("parallel",))
    if vmem_limit is not None:
        cp_kwargs["vmem_limit_bytes"] = vmem_limit

    out_head = pl.pallas_call(
        _htanh_kernel,
        out_shape=jax.ShapeDtypeStruct((rows, LANES), dtype),
        grid_spec=pltpu.PrefetchScalarGridSpec(
            num_scalar_prefetch=0,
            grid=grid,
            in_specs=[pl.BlockSpec((tile_rows, LANES), lambda i: (i, 0))],
            out_specs=pl.BlockSpec((tile_rows, LANES), lambda i: (i, 0)),
        ),
        compiler_params=pltpu.CompilerParams(**cp_kwargs),
    )(head)

    out_flat = out_head.reshape(-1)
    if tail:
        tail_out = htanh_ref(flat[aligned:]).astype(dtype)
        out_flat = jnp.concatenate([out_flat, tail_out])
    return out_flat.reshape(orig_shape)


if __name__ == "__main__":
    key = jax.random.PRNGKey(0)

    # NCHW input, same convention as the PyTorch module: (2, 4, 16, 16).
    x = jax.random.normal(key, (2, 4, 16, 16), dtype=jnp.float32) * 4.0
    y = htanh(x)
    jax.block_until_ready(y)
    assert y.shape == x.shape and y.dtype == x.dtype
    assert jnp.allclose(y, htanh_ref(x), atol=1e-6), "mismatch vs reference (f32)"

    # Odd-sized input to exercise the unaligned-tail path (no pad/slice copies).
    x2 = jax.random.normal(jax.random.PRNGKey(1), (3, 5, 7, 11), dtype=jnp.float32) * 4.0
    y2 = htanh(x2)
    jax.block_until_ready(y2)
    assert y2.shape == x2.shape and y2.dtype == x2.dtype
    assert jnp.allclose(y2, htanh_ref(x2), atol=1e-6), "mismatch vs reference (tail path)"

    # Larger aligned input to exercise the multi-block (parallel) grid path.
    x3 = jax.random.normal(jax.random.PRNGKey(2), (2, 4, 64, 64), dtype=jnp.float32) * 4.0
    y3 = htanh(x3)
    jax.block_until_ready(y3)
    assert jnp.allclose(y3, htanh_ref(x3), atol=1e-6), "mismatch vs reference (multi-block)"

    # bf16 input (f32 compute inside the kernel, cast back).
    x4 = (jax.random.normal(jax.random.PRNGKey(3), (2, 4, 16, 16), dtype=jnp.float32) * 4.0
          ).astype(jnp.bfloat16)
    y4 = htanh(x4)
    jax.block_until_ready(y4)
    assert y4.dtype == jnp.bfloat16
    assert jnp.allclose(y4.astype(jnp.float32),
                        htanh_ref(x4.astype(jnp.float32)), atol=2e-2), "mismatch (bf16)"

    print("KERNEL_OK")
</pallas_src>

<mosaic_0001>
module attributes {stable_mosaic.version = 11 : i64} {
  func.func @_htanh_kernel(%arg0: i32, %arg1: memref<2x1024xf32, #tpu.memory_space<vmem>>, %arg2: memref<2x1024xf32, #tpu.memory_space<vmem>>) attributes {dimension_semantics = [#tpu.dimension_semantics<parallel>], iteration_bounds = array<i64: 1>, scalar_prefetch = 0 : i64, scratch_operands = 0 : i64, tpu.core_type = #tpu.core_type<tc>, window_params = [{transform_indices = @transform_0, window_bounds = array<i64: 2, 1024>}, {transform_indices = @transform_1, window_bounds = array<i64: 2, 1024>}]} {
    %c0 = arith.constant 0 : index
    %c0_0 = arith.constant 0 : index
    %0 = vector.load %arg1[%c0, %c0_0] : memref<2x1024xf32, #tpu.memory_space<vmem>>, vector<2x1024xf32>
    %cst = arith.constant 0.000000e+00 : f32
    %1 = vector.broadcast %cst : f32 to vector<2x1024xf32>
    %2 = arith.maximumf %0, %1 : vector<2x1024xf32>
    %cst_1 = arith.constant 6.000000e+00 : f32
    %3 = vector.broadcast %cst_1 : f32 to vector<2x1024xf32>
    %4 = arith.minimumf %2, %3 : vector<2x1024xf32>
    %cst_2 = arith.constant 0.333333343 : f32
    %5 = vector.broadcast %cst_2 : f32 to vector<2x1024xf32>
    %6 = arith.mulf %4, %5 : vector<2x1024xf32>
    %cst_3 = arith.constant 1.000000e+00 : f32
    %7 = vector.broadcast %cst_3 : f32 to vector<2x1024xf32>
    %8 = arith.subf %6, %7 : vector<2x1024xf32>
    %c0_4 = arith.constant 0 : index
    %c0_5 = arith.constant 0 : index
    %9 = vector.load %arg2[%c0_4, %c0_5] : memref<2x1024xf32, #tpu.memory_space<vmem>>, vector<2x1024xf32>
    tpu.vector_store %arg2[%c0_4, %c0_5], %8 {strides = array<i32>} : memref<2x1024xf32, #tpu.memory_space<vmem>>, vector<2x1024xf32>,
    return
  }
  func.func @transform_0(%arg0: i32) -> (i32, i32) {
    %c0_i32 = arith.constant 0 : i32
    %c0_i32_0 = arith.constant 0 : i32
    return %arg0, %c0_i32 : i32, i32
  }
  func.func @transform_1(%arg0: i32) -> (i32, i32) {
    %c0_i32 = arith.constant 0 : i32
    %c0_i32_0 = arith.constant 0 : i32
    return %arg0, %c0_i32 : i32, i32
  }
}

</mosaic_0001>

<bundles_post_ra>
// kernel: tpu_custom_call.1
= control target key start
LH: loop header
LB: loop body
LE: loop exit
PB: predicated region body
PF: predicated region fallthrough
CT: control target
= control target key end

     0   :  { %6 = vsyncpa [#allocation3], 0  ;;  %s114_s0 = inlined_call_operand.hbm [shape: f32[2,1024], index: 0, kind: input, shape index: {}]   ;;  %s115_s1 = inlined_call_operand.hbm [shape: f32[2,1024], index: 1, kind: output, shape index: {}]  }
   0x1   :  { %7 = vsyncpa [#allocation4], 0  ;;  %s96_s6 = smov [#allocation2]  }
   0x2   :  { %s14_s7 = sshll.u32 %s96_s6, 4  ;;  %s15_s7 = int_to_ptr.vmem [resolvable:$true] %s14_s7 }
   0x3   :  { %s60_s8 = scalar_lea.vmem %s15_s7, 256  ;;  %p65_p1 = scmp.lt.s32.totalorder %s15_s7, %s15_s7 }
   0x4   :  { %p61_p0 = scmp.ne.s32.totalorder %s15_s7, %s60_s8  ;;  %p66_p2 = scmp.lt.s32.totalorder %s60_s8, %s60_s8 }
   0x6   :  { %p67_p3 = por %p66_p2, %p65_p1 }
   0x8   :  { %p68_p4 = pnand %p67_p3, %p61_p0 }
   0xa   :  { %71 = shalt.err (!%p68_p4)
}
   0xb   :  { %17 = dma.hbm_to_vmem [thread:$0]  %s114_s0, 256, %s15_s7, [#allocation3]  }
   0xc   :  { %92 = dma.done.wait [#allocation3], 256  }
   0xd   :  { %93 = vsyncadd [#allocation3], 4294967040  ;;  %v21_v0 = vld [vmem:[#allocation2] sm:$0xff]  ;;  %v22_v1 = vld [vmem:[#allocation2 + $0x8] sm:$0xff]  ;;  %s97_s11 = smov [#allocation5]  }
   0xe   :  { %v23_v2 = vmax.f32 %v21_v0, 0.0  ;;  %v24_v3 = vmax.f32 %v22_v1, 0.0  ;;  %s39_s12 = sshll.u32 %s97_s11, 4  ;;  %s40_s12 = int_to_ptr.vmem [resolvable:$true] %s39_s12 }
   0xf   :  { %s72_s13 = scalar_lea.vmem %s40_s12, 256  ;;  %p77_p6 = scmp.lt.s32.totalorder %s40_s12, %s40_s12 }
  0x10   :  { %v25_v4 = vmin.f32 %v23_v2, 6.0  ;;  %v26_v5 = vmin.f32 %v24_v3, 6.0  ;;  %p73_p5 = scmp.ne.s32.totalorder %s40_s12, %s72_s13  ;;  %p78_p7 = scmp.lt.s32.totalorder %s72_s13, %s72_s13 }
  0x12   :  { %v27_v6 = vmul.f32 0.33333334, %v25_v4  ;;  %v28_v7 = vmul.f32 0.33333334, %v26_v5  ;;  %p79_p8 = por %p78_p7, %p77_p6 }
  0x14   :  { %v48_v8 = vadd.f32 -1.0, %v27_v6  ;;  %v49_v9 = vadd.f32 -1.0, %v28_v7  ;;  %p80_p9 = pnand %p79_p8, %p73_p5 }
  0x16   :  { %31 = vst [vmem:[#allocation5] sm:$0xff] %v48_v8  ;;  %32 = vst [vmem:[#allocation5 + $0x8] sm:$0xff] %v49_v9 }
  0x17   :  { %83 = shalt.err (!%p80_p9)
}
  0x18   :  { %42 = dma.vmem_to_hbm [thread:$0]  %s40_s12, 256, %s115_s1, [#allocation4]  }
  0x19   :  { %94 = dma.done.wait [#allocation4], 256  }
  0x1a   :  { %95 = vsyncadd [#allocation4], 4294967040 }
  0x1b   :  { %46 = vsyncpa [#allocation3], 1 }
  0x1c   :  { %47 = vsyncpa [#allocation4], 1 }

</bundles_post_ra>
